<compile_context>
chip_gen: v7x
topology: tpu7x:2x2x1
jax: 0.10.0
libtpu: 0.0.40
codegen_flags: <defaults>
</compile_context>

<pallas_src>
import numpy as np
import jax
import jax.numpy as jnp
from jax import lax
from jax.experimental import pallas as pl
from jax.experimental.pallas import tpu as pltpu


# ----------------------------- diffusion buffers -----------------------------

def cosine_beta_schedule(timesteps: int, s: float = 0.008) -> np.ndarray:
    steps = timesteps + 1
    x = np.linspace(0, timesteps, steps, dtype=np.float64)
    alphas_cumprod = np.cos((x / timesteps + s) / (1 + s) * np.pi * 0.5) ** 2
    alphas_cumprod = alphas_cumprod / alphas_cumprod[0]
    betas = 1 - alphas_cumprod[1:] / alphas_cumprod[:-1]
    return np.clip(betas, 0, 0.9999)


def make_diffusion_buffers(timesteps: int):
    betas = cosine_beta_schedule(timesteps)
    alphas = 1.0 - betas
    alphas_cumprod = np.cumprod(alphas, axis=0)
    return {
        "sqrt_alphas_cumprod": jnp.asarray(
            np.sqrt(alphas_cumprod), dtype=jnp.float32),
        "sqrt_one_minus_alphas_cumprod": jnp.asarray(
            np.sqrt(1.0 - alphas_cumprod), dtype=jnp.float32),
    }


# ------------------------------ small helpers --------------------------------

def _round_up(a: int, b: int) -> int:
    return (a + b - 1) // b * b


def _cdiv(a: int, b: int) -> int:
    return (a + b - 1) // b


def _pick_group(n: int, max_group: int = 8) -> int:
    """Largest power-of-two pixel-group size (<= 8) dividing N (G=1 is always ok)."""
    g = max_group
    while g > 1 and n % g != 0:
        g //= 2
    return g


def _pick_tile_lanes(width: int, max_lanes: int = 4096) -> int:
    """Lane-tile size: multiple of 128, as large as useful, capped by VMEM budget."""
    t = min(max_lanes, _round_up(width, 128))
    return max(128, (t // 128) * 128)


def _pack_block_diag(w, g: int):
    """w: (M, K) -> (M*g, K*g) with out[m*g + i, k*g + i] = w[m, k] (zeros elsewhere)."""
    m, k = w.shape
    eye = jnp.eye(g, dtype=w.dtype)
    return (w[:, None, :, None] * eye[None, :, None, :]).reshape(m * g, k * g)


# --------------------------------- wrapper ------------------------------------

def gaussian_diffusion_forward(x, t, noise, params, buffers,
                               tile_lanes=None, group=None):
    """x: (B, C, F, H, W) in [0, 1]; t: (B,) int32; noise: like x. Returns scalar L1 loss."""
    B, C, F, H, W = x.shape
    N = F * H * W
    Hd = params["w1"].shape[0]

    G = group if group is not None else _pick_group(N)
    assert N % G == 0, "pixel-group size must divide F*H*W"
    Wn = N // G                 # grouped lane-axis width (pixels per group)
    R = C * G                   # rows of the grouped data tile (channels x groups)
    HdG = Hd * G

    TNg = tile_lanes if tile_lanes is not None else _pick_tile_lanes(Wn)
    assert TNg % 128 == 0
    num_n = _cdiv(Wn, TNg)      # cdiv grid: no exact-divisor requirement
    ragged = (Wn % TNg) != 0

    # FREE reshapes only (split + merge of adjacent row-major axes): row
    # c*G + g of x_g holds channel c of pixels [g*Wn, (g+1)*Wn).  Inputs stay
    # in their HBM dtype (f32 here) -- no extra cast pass before the kernel.
    x_g = x.reshape(B, C, G, Wn).reshape(B, R, Wn)
    nz_g = noise.reshape(B, C, G, Wn).reshape(B, R, Wn)

    # Per-batch scalars / small packed weights (host-side, tiny).
    coef_a = buffers["sqrt_alphas_cumprod"][t].astype(jnp.float32)            # (B,)
    coef_s = buffers["sqrt_one_minus_alphas_cumprod"][t].astype(jnp.float32)  # (B,)
    bias1 = params["temb_table"][t] + params["b1"][:, 0][None, :]             # (B, Hd)
    bias1_blk = jnp.repeat(bias1, G, axis=1)[:, :, None].astype(jnp.float32)  # (B, Hd*G, 1)
    w1_blk = _pack_block_diag(params["w1"].astype(jnp.bfloat16), G)           # (Hd*G, C*G)
    w2_blk = _pack_block_diag(params["w2"].astype(jnp.bfloat16), G)           # (C*G, Hd*G)
    b2_blk = jnp.repeat(params["b2"], G, axis=0).astype(jnp.float32)          # (C*G, 1)

    def kernel(coef_a_ref, coef_s_ref,        # SMEM (B,) f32
               x_ref, nz_ref,                 # VMEM (1, R, TNg) f32
               w1_ref, bias1_ref,             # VMEM (Hd*G, R) bf16 / (1, Hd*G, 1) f32
               w2_ref, b2_ref,                # VMEM (R, Hd*G) bf16 / (R, 1) f32
               out_ref,                       # VMEM (1, 1, 1) f32
               acc_ref):                      # VMEM (R, TNg) f32 scratch
        b = pl.program_id(0)
        n = pl.program_id(1)
        n_last = pl.num_programs(1) - 1

        a = coef_a_ref[b]                     # sqrt_alphas_cumprod[t[b]]
        s = coef_s_ref[b]                     # sqrt_one_minus_alphas_cumprod[t[b]]

        # NOTE: correctness of this init/finalize pattern requires the n axis
        # to be the innermost grid axis with whole-b ownership per core.
        @pl.when(n == 0)
        def _():
            acc_ref[...] = jnp.zeros_like(acc_ref)

        xg = x_ref[0]                         # (R, TNg) f32
        nz = nz_ref[0]                        # (R, TNg) f32

        # q_sample with forward()'s x*2-1 rescale folded in: a*(2x-1) + s*nz.
        x_noisy = (2.0 * a) * xg + s * nz - a

        # Synthetic denoise_fn: grouped channel-MLP, bf16 MXU matmuls with f32
        # accumulation; hardtanh (VPU clip) instead of tanh (no EUP ceiling).
        h = jnp.dot(w1_ref[...], x_noisy.astype(jnp.bfloat16),
                    preferred_element_type=jnp.float32)          # (Hd*G, TNg) f32
        h = jnp.clip(h + bias1_ref[0], -1.0, 1.0)
        x_recon = jnp.dot(w2_ref[...], h.astype(jnp.bfloat16),
                          preferred_element_type=jnp.float32) + b2_ref[...]

        # Elementwise L1 partial, accumulated full-tile (pure VPU adds).
        l1 = jnp.abs(nz - x_recon)
        if ragged:                            # static: only if a ragged last tile exists
            lane = lax.broadcasted_iota(jnp.int32, (1, TNg), 1)
            l1 = jnp.where(n * TNg + lane < Wn, l1, 0.0)
        acc_ref[...] = acc_ref[...] + l1

        @pl.when(n == n_last)
        def _():
            out_ref[...] = jnp.sum(acc_ref[...]).reshape(1, 1, 1)

    flops = B * N * (4 * C * Hd + 16)
    bytes_accessed = 2 * B * C * N * x.dtype.itemsize + 4 * B

    partial = pl.pallas_call(
        kernel,
        out_shape=jax.ShapeDtypeStruct((B, 1, 1), jnp.float32),
        grid_spec=pltpu.PrefetchScalarGridSpec(
            num_scalar_prefetch=0,
            grid=(B, num_n),
            in_specs=[
                pl.BlockSpec(memory_space=pltpu.MemorySpace.SMEM),     # coef_a
                pl.BlockSpec(memory_space=pltpu.MemorySpace.SMEM),     # coef_s
                pl.BlockSpec((1, R, TNg), lambda b, n: (b, 0, n)),     # x (grouped)
                pl.BlockSpec((1, R, TNg), lambda b, n: (b, 0, n)),     # noise (grouped)
                pl.BlockSpec((HdG, R), lambda b, n: (0, 0)),           # w1_blk
                pl.BlockSpec((1, HdG, 1), lambda b, n: (b, 0, 0)),     # bias1_blk (temb+b1)
                pl.BlockSpec((R, HdG), lambda b, n: (0, 0)),           # w2_blk
                pl.BlockSpec((R, 1), lambda b, n: (0, 0)),             # b2_blk
            ],
            out_specs=pl.BlockSpec((1, 1, 1), lambda b, n: (b, 0, 0)),
            scratch_shapes=[pltpu.VMEM((R, TNg), jnp.float32)],
        ),
        compiler_params=pltpu.CompilerParams(
            dimension_semantics=("parallel", "arbitrary"),
            vmem_limit_bytes=32 * 1024 * 1024,
        ),
        cost_estimate=pl.CostEstimate(
            flops=flops, transcendentals=0, bytes_accessed=bytes_accessed),
    )(coef_a, coef_s, x_g, nz_g, w1_blk, bias1_blk, w2_blk, b2_blk)

    # mean over all elements -> scalar L1 loss
    return jnp.sum(partial) / (B * C * N)


# pure-JAX reference for correctness checking (f32 math everywhere except the
# bf16 matmul inputs, mirroring the kernel's MXU numerics).
def _reference(x, t, noise, params, buffers):
    B, C = x.shape[0], x.shape[1]
    xf = x.reshape(B, C, -1).astype(jnp.float32)
    nf = noise.reshape(B, C, -1).astype(jnp.float32)
    a = buffers["sqrt_alphas_cumprod"][t].reshape(B, 1, 1)
    s = buffers["sqrt_one_minus_alphas_cumprod"][t].reshape(B, 1, 1)
    x_noisy = a * (xf * 2.0 - 1.0) + s * nf
    w1 = params["w1"].astype(jnp.bfloat16)
    w2 = params["w2"].astype(jnp.bfloat16)
    temb = params["temb_table"][t][:, :, None]
    h = jnp.einsum("hc,bcn->bhn", w1, x_noisy.astype(jnp.bfloat16),
                   preferred_element_type=jnp.float32)
    h = jnp.clip(h + temb + params["b1"][None], -1.0, 1.0)
    x_recon = jnp.einsum("ch,bhn->bcn", w2, h.astype(jnp.bfloat16),
                         preferred_element_type=jnp.float32) + params["b2"][None]
    return jnp.mean(jnp.abs(nf - x_recon))


if __name__ == "__main__":
    B, C = 2, 4
    Hd = 32
    TIMESTEPS = 1000

    key = jax.random.PRNGKey(0)
    k_x, k_t, k_n, k_w1, k_w2, k_temb, k_x2, k_n2 = jax.random.split(key, 8)

    params = {
        "w1": (0.2 * jax.random.normal(k_w1, (Hd, C))).astype(jnp.float32),
        "b1": jnp.zeros((Hd, 1), jnp.float32),
        "w2": (0.2 * jax.random.normal(k_w2, (C, Hd))).astype(jnp.float32),
        "b2": jnp.zeros((C, 1), jnp.float32),
        "temb_table": (0.1 * jax.random.normal(
            k_temb, (TIMESTEPS, Hd))).astype(jnp.float32),
    }
    buffers = make_diffusion_buffers(TIMESTEPS)

    # t is sampled inside forward() in the PyTorch module; passed explicitly here.
    t = jax.random.randint(k_t, (B,), 0, TIMESTEPS, dtype=jnp.int32)

    # Case 1: (b, c, f, h, w) = (2, 4, 8, 16, 16); default (largest) tiling.
    x = jax.random.uniform(k_x, (B, C, 8, 16, 16), dtype=jnp.float32)
    noise = jax.random.normal(k_n, (B, C, 8, 16, 16), dtype=jnp.float32)
    loss = jax.block_until_ready(
        gaussian_diffusion_forward(x, t, noise, params, buffers))
    ref = jax.block_until_ready(_reference(x, t, noise, params, buffers))
    np.testing.assert_allclose(np.asarray(loss), np.asarray(ref),
                               rtol=5e-3, atol=1e-4)

    # Case 2: num_frames=6 -> grouped lane width 192 with tile_lanes=128:
    # exercises multi-step accumulation AND the ragged last-tile lane mask.
    x2 = jax.random.uniform(k_x2, (B, C, 6, 16, 16), dtype=jnp.float32)
    noise2 = jax.random.normal(k_n2, (B, C, 6, 16, 16), dtype=jnp.float32)
    loss2 = jax.block_until_ready(
        gaussian_diffusion_forward(x2, t, noise2, params, buffers,
                                   tile_lanes=128))
    ref2 = jax.block_until_ready(_reference(x2, t, noise2, params, buffers))
    np.testing.assert_allclose(np.asarray(loss2), np.asarray(ref2),
                               rtol=5e-3, atol=1e-4)

    print("KERNEL_OK")
</pallas_src>

<mosaic_0001>
module attributes {stable_mosaic.version = 11 : i64} {
  func.func @kernel(%arg0: i32, %arg1: i32, %arg2: memref<2xf32, #tpu.memory_space<smem>>, %arg3: memref<2xf32, #tpu.memory_space<smem>>, %arg4: memref<1x32x256xf32, #tpu.memory_space<vmem>>, %arg5: memref<1x32x256xf32, #tpu.memory_space<vmem>>, %arg6: memref<256x32xbf16, #tpu.memory_space<vmem>>, %arg7: memref<1x256x1xf32, #tpu.memory_space<vmem>>, %arg8: memref<32x256xbf16, #tpu.memory_space<vmem>>, %arg9: memref<32x1xf32, #tpu.memory_space<vmem>>, %arg10: memref<1x1x1xf32, #tpu.memory_space<vmem>>, %arg11: memref<32x256xf32, #tpu.memory_space<vmem>>) attributes {dimension_semantics = [#tpu.dimension_semantics<parallel>, #tpu.dimension_semantics<arbitrary>], iteration_bounds = array<i64: 2, 1>, scalar_prefetch = 0 : i64, scratch_operands = 1 : i64, tpu.core_type = #tpu.core_type<tc>, window_params = [{transform_indices = @transform_0, window_bounds = array<i64: 2>}, {transform_indices = @transform_1, window_bounds = array<i64: 2>}, {transform_indices = @transform_2, window_bounds = array<i64: 1, 32, 256>}, {transform_indices = @transform_3, window_bounds = array<i64: 1, 32, 256>}, {pipeline_mode = #tpu.pipeline_mode<synchronous>, transform_indices = @transform_4, window_bounds = array<i64: 256, 32>}, {transform_indices = @transform_5, window_bounds = array<i64: 1, 256, 1>}, {pipeline_mode = #tpu.pipeline_mode<synchronous>, transform_indices = @transform_6, window_bounds = array<i64: 32, 256>}, {pipeline_mode = #tpu.pipeline_mode<synchronous>, transform_indices = @transform_7, window_bounds = array<i64: 32, 1>}, {transform_indices = @transform_8, window_bounds = array<i64: 1, 1, 1>}]} {
    %0 = arith.index_cast %arg0 : i32 to index
    %1 = memref.load %arg2[%0] : memref<2xf32, #tpu.memory_space<smem>>
    %2 = arith.index_cast %arg0 : i32 to index
    %3 = memref.load %arg3[%2] : memref<2xf32, #tpu.memory_space<smem>>
    %c0_i32 = arith.constant 0 : i32
    %4 = arith.cmpi eq, %arg1, %c0_i32 : i32
    %5 = arith.extui %4 : i1 to i32
    %c0_i32_0 = arith.constant 0 : i32
    %6 = arith.cmpi ne, %5, %c0_i32_0 : i32
    scf.if %6 {
      %cst_25 = arith.constant 0.000000e+00 : f32
      %44 = vector.broadcast %cst_25 : f32 to vector<32x256xf32>
      %c0_26 = arith.constant 0 : index
      %c0_27 = arith.constant 0 : index
      %45 = vector.load %arg11[%c0_26, %c0_27] : memref<32x256xf32, #tpu.memory_space<vmem>>, vector<32x256xf32>
      tpu.vector_store %arg11[%c0_26, %c0_27], %44 {strides = array<i32>} : memref<32x256xf32, #tpu.memory_space<vmem>>, vector<32x256xf32>,
    } else {
    }
    %c0 = arith.constant 0 : index
    %c0_1 = arith.constant 0 : index
    %c0_2 = arith.constant 0 : index
    %7 = vector.load %arg4[%c0, %c0_1, %c0_2] : memref<1x32x256xf32, #tpu.memory_space<vmem>>, vector<1x32x256xf32>
    %8 = vector.shape_cast %7 : vector<1x32x256xf32> to vector<32x256xf32>
    %c0_3 = arith.constant 0 : index
    %c0_4 = arith.constant 0 : index
    %c0_5 = arith.constant 0 : index
    %9 = vector.load %arg5[%c0_3, %c0_4, %c0_5] : memref<1x32x256xf32, #tpu.memory_space<vmem>>, vector<1x32x256xf32>
    %10 = vector.shape_cast %9 : vector<1x32x256xf32> to vector<32x256xf32>
    %cst = arith.constant 2.000000e+00 : f32
    %11 = arith.mulf %cst, %1 : f32
    %12 = vector.broadcast %11 : f32 to vector<32x256xf32>
    %13 = arith.mulf %12, %8 : vector<32x256xf32>
    %14 = vector.broadcast %3 : f32 to vector<32x256xf32>
    %15 = arith.mulf %14, %10 : vector<32x256xf32>
    %16 = arith.addf %13, %15 : vector<32x256xf32>
    %17 = vector.broadcast %1 : f32 to vector<32x256xf32>
    %18 = arith.subf %16, %17 : vector<32x256xf32>
    %c0_6 = arith.constant 0 : index
    %c0_7 = arith.constant 0 : index
    %19 = vector.load %arg6[%c0_6, %c0_7] : memref<256x32xbf16, #tpu.memory_space<vmem>>, vector<256x32xbf16>
    %20 = arith.truncf %18 : vector<32x256xf32> to vector<32x256xbf16>
    %cst_8 = arith.constant dense<0.000000e+00> : vector<256x256xf32>
    %21 = tpu.matmul %19, %20, %cst_8 {dimension_numbers = #tpu.dot_dimension_numbers<[1], [0], [0], [1], [0, 0, 1, 1], [], []>} : vector<256x32xbf16>, vector<32x256xbf16>, vector<256x256xf32> -> vector<256x256xf32>
    %c0_9 = arith.constant 0 : index
    %c0_10 = arith.constant 0 : index
    %c0_11 = arith.constant 0 : index
    %22 = vector.load %arg7[%c0_9, %c0_10, %c0_11] : memref<1x256x1xf32, #tpu.memory_space<vmem>>, vector<1x256x1xf32>
    %23 = vector.shape_cast %22 : vector<1x256x1xf32> to vector<256x1xf32>
    %24 = vector.broadcast %23 : vector<256x1xf32> to vector<256x256xf32>
    %25 = arith.addf %21, %24 : vector<256x256xf32>
    %cst_12 = arith.constant -1.000000e+00 : f32
    %cst_13 = arith.constant 1.000000e+00 : f32
    %26 = vector.broadcast %cst_12 : f32 to vector<256x256xf32>
    %27 = arith.maximumf %26, %25 : vector<256x256xf32>
    %28 = vector.broadcast %cst_13 : f32 to vector<256x256xf32>
    %29 = arith.minimumf %28, %27 : vector<256x256xf32>
    %c0_14 = arith.constant 0 : index
    %c0_15 = arith.constant 0 : index
    %30 = vector.load %arg8[%c0_14, %c0_15] : memref<32x256xbf16, #tpu.memory_space<vmem>>, vector<32x256xbf16>
    %31 = arith.truncf %29 : vector<256x256xf32> to vector<256x256xbf16>
    %cst_16 = arith.constant dense<0.000000e+00> : vector<32x256xf32>
    %32 = tpu.matmul %30, %31, %cst_16 {dimension_numbers = #tpu.dot_dimension_numbers<[1], [0], [0], [1], [0, 0, 1, 1], [], []>} : vector<32x256xbf16>, vector<256x256xbf16>, vector<32x256xf32> -> vector<32x256xf32>
    %c0_17 = arith.constant 0 : index
    %c0_18 = arith.constant 0 : index
    %33 = vector.load %arg9[%c0_17, %c0_18] : memref<32x1xf32, #tpu.memory_space<vmem>>, vector<32x1xf32>
    %34 = vector.broadcast %33 : vector<32x1xf32> to vector<32x256xf32>
    %35 = arith.addf %32, %34 : vector<32x256xf32>
    %36 = arith.subf %10, %35 : vector<32x256xf32>
    %37 = math.absf %36 : vector<32x256xf32>
    %c0_19 = arith.constant 0 : index
    %c0_20 = arith.constant 0 : index
    %38 = vector.load %arg11[%c0_19, %c0_20] : memref<32x256xf32, #tpu.memory_space<vmem>>, vector<32x256xf32>
    %39 = arith.addf %38, %37 : vector<32x256xf32>
    %c0_21 = arith.constant 0 : index
    %c0_22 = arith.constant 0 : index
    %40 = vector.load %arg11[%c0_21, %c0_22] : memref<32x256xf32, #tpu.memory_space<vmem>>, vector<32x256xf32>
    tpu.vector_store %arg11[%c0_21, %c0_22], %39 {strides = array<i32>} : memref<32x256xf32, #tpu.memory_space<vmem>>, vector<32x256xf32>,
    %c0_i32_23 = arith.constant 0 : i32
    %41 = arith.cmpi eq, %arg1, %c0_i32_23 : i32
    %42 = arith.extui %41 : i1 to i32
    %c0_i32_24 = arith.constant 0 : i32
    %43 = arith.cmpi ne, %42, %c0_i32_24 : i32
    scf.if %43 {
      %c0_25 = arith.constant 0 : index
      %c0_26 = arith.constant 0 : index
      %44 = vector.load %arg11[%c0_25, %c0_26] : memref<32x256xf32, #tpu.memory_space<vmem>>, vector<32x256xf32>
      %45 = vector.shape_cast %44 : vector<32x256xf32> to vector<1x32x256xf32>
      %cst_27 = arith.constant dense<0.000000e+00> : vector<1xf32>
      %46 = vector.multi_reduction <add>, %45, %cst_27 [1, 2] : vector<1x32x256xf32> to vector<1xf32>
      %47 = vector.shape_cast %46 : vector<1xf32> to vector<1x1x1xf32>
      %48 = vector.extract %47[0, 0, 0] : f32 from vector<1x1x1xf32>
      %49 = vector.broadcast %48 : f32 to vector<1x1x1xf32>
      %c0_28 = arith.constant 0 : index
      %c0_29 = arith.constant 0 : index
      %c0_30 = arith.constant 0 : index
      %50 = vector.load %arg10[%c0_28, %c0_29, %c0_30] : memref<1x1x1xf32, #tpu.memory_space<vmem>>, vector<1x1x1xf32>
      tpu.vector_store %arg10[%c0_28, %c0_29, %c0_30], %49 {strides = array<i32>} : memref<1x1x1xf32, #tpu.memory_space<vmem>>, vector<1x1x1xf32>,
    } else {
    }
    return
  }
  func.func @transform_0(%arg0: i32, %arg1: i32) -> i32 {
    %c0_i32 = arith.constant 0 : i32
    %c0_i32_0 = arith.constant 0 : i32
    return %c0_i32 : i32
  }
  func.func @transform_1(%arg0: i32, %arg1: i32) -> i32 {
    %c0_i32 = arith.constant 0 : i32
    %c0_i32_0 = arith.constant 0 : i32
    return %c0_i32 : i32
  }
  func.func @transform_2(%arg0: i32, %arg1: i32) -> (i32, i32, i32) {
    %c0_i32 = arith.constant 0 : i32
    %c0_i32_0 = arith.constant 0 : i32
    return %arg0, %c0_i32, %arg1 : i32, i32, i32
  }
  func.func @transform_3(%arg0: i32, %arg1: i32) -> (i32, i32, i32) {
    %c0_i32 = arith.constant 0 : i32
    %c0_i32_0 = arith.constant 0 : i32
    return %arg0, %c0_i32, %arg1 : i32, i32, i32
  }
  func.func @transform_4(%arg0: i32, %arg1: i32) -> (i32, i32) {
    %c0_i32 = arith.constant 0 : i32
    %c0_i32_0 = arith.constant 0 : i32
    %c0_i32_1 = arith.constant 0 : i32
    return %c0_i32, %c0_i32_0 : i32, i32
  }
  func.func @transform_5(%arg0: i32, %arg1: i32) -> (i32, i32, i32) {
    %c0_i32 = arith.constant 0 : i32
    %c0_i32_0 = arith.constant 0 : i32
    %c0_i32_1 = arith.constant 0 : i32
    return %arg0, %c0_i32, %c0_i32_0 : i32, i32, i32
  }
  func.func @transform_6(%arg0: i32, %arg1: i32) -> (i32, i32) {
    %c0_i32 = arith.constant 0 : i32
    %c0_i32_0 = arith.constant 0 : i32
    %c0_i32_1 = arith.constant 0 : i32
    return %c0_i32, %c0_i32_0 : i32, i32
  }
  func.func @transform_7(%arg0: i32, %arg1: i32) -> (i32, i32) {
    %c0_i32 = arith.constant 0 : i32
    %c0_i32_0 = arith.constant 0 : i32
    %c0_i32_1 = arith.constant 0 : i32
    return %c0_i32, %c0_i32_0 : i32, i32
  }
  func.func @transform_8(%arg0: i32, %arg1: i32) -> (i32, i32, i32) {
    %c0_i32 = arith.constant 0 : i32
    %c0_i32_0 = arith.constant 0 : i32
    %c0_i32_1 = arith.constant 0 : i32
    return %arg0, %c0_i32, %c0_i32_0 : i32, i32, i32
  }
}

</mosaic_0001>

<bundles_post_ra>
// kernel: tpu_custom_call.1
= control target key start
LH: loop header
LB: loop body
LE: loop exit
PB: predicated region body
PF: predicated region fallthrough
CT: control target
= control target key end

     0   :  { %13 = vsyncpa [#allocation4], 0  ;;  %s2052_s0 = inlined_call_operand.vmem [shape: f32[2], index: 0, kind: input, shape index: {}]   ;;  %s2053_s1 = inlined_call_operand.vmem [shape: f32[2], index: 1, kind: input, shape index: {}]   ;;  %s2054_s2 = inlined_call_operand.vmem [shape: f32[2,32,256], index: 2, kind: input, shape index: {}]   ;;  %s2055_s3 = inlined_call_operand.vmem [shape: f32[2,32,256], index: 3, kind: input, shape index: {}]   ;;  %s2056_s4 = inlined_call_operand.vmem [shape: bf16[256,32], index: 4, kind: input, shape index: {}]   ;;  %s2057_s5 = inlined_call_operand.vmem [shape: f32[2,256,1], index: 5, kind: input, shape index: {}]   ;;  %s2058_s6 = inlined_call_operand.vmem [shape: bf16[32,256], index: 6, kind: input, shape index: {}]   ;;  %s2059_s7 = inlined_call_operand.vmem [shape: f32[32,1], index: 7, kind: input, shape index: {}]   ;;  %s2060_s8 = inlined_call_operand.vmem [shape: f32[2,1,1], index: 8, kind: output, shape index: {}]  }
   0x1   :  { %14 = vsyncpa [#allocation6], 0  ;;  %s1780_s27 = smov 0   ;;  %s1782_s28 = smov 0  }
   0x2   :  { %s1784_s29 = smov 0  }
   0x3 LB: > { %s1475_s30 = sadd.s32 4294967295, %s1730_s29   ;;  %s32_s9 = sadd.s32 1, %s1726_s28  ;;  %s1730_s29 = sphi %s1784_s29, %s20_s29   ;;  %s1726_s28 = sphi %s1782_s28, %s2070_s28   ;;  %s1722_s27 = sphi %s1780_s27, %s2069_s27  }
   0x4   : > { %p34_p0 = scmp.ge.s32.totalorder %s32_s9, 2  ;;  %p1477_p1 = scmp.ge.s32.totalorder %s1730_s29, 1 }
   0x5   : > { %p250_p2 = scmp.lt.s32.totalorder %s1730_s29, 3  ;;  %p1805_p4 = scmp.eq.s32.totalorder %s1475_s30, 0 }
   0x6   : > { %s2072_s9 = smov (%p34_p0, %s32_s9), 0  ;;  %s263_s14 = sshll.u32 %s2052_s0, 4  ;;  %s264_s14 = int_to_ptr.vmem [resolvable:$true] %s263_s14 }
   0x7   : > { %p1801_p3 = pnand %p1477_p1, %p250_p2  ;;  %s274_s17 = sshll.u32 %s2053_s1, 4  ;;  %s275_s17 = int_to_ptr.vmem [resolvable:$true] %s274_s17 }
   0x8   : > { %s2065_s11 = scalar_select %p1805_p4, 1, 0 }
   0x9   : > { %s2064_s10 = scalar_select %p1801_p3, 1, 0 }
   0xa   : > { %p1605_p5 = pneg %p1801_p3  ;;  %s1670_s19 = scalar_lea.vmem %s264_s14, 16 }
   0xb   : > { %p1671_p7 = scmp.ne.s32.totalorder %s264_s14, %s1670_s19  ;;  %p1678_p11 = scmp.lt.s32.totalorder %s264_s14, %s264_s14 }
   0xc   : > { %p1819_p6 = pnand %p1805_p4, %p1605_p5  ;;  %p1679_p12 = scmp.lt.s32.totalorder %s1670_s19, %s1670_s19 }
   0xe   : > { %p1672_p8 = pneg %p1819_p6  ;;  %p1680_p13 = por %p1679_p12, %p1678_p11 }
  0x10   : > { %p1673_p9 = pnand %p1672_p8, %p1671_p7 }
  0x12   : > { %p1674_p10 = pneg %p1673_p9 }
  0x14   : > { %p1681_p0 = pnand %p1680_p13, %p1674_p10 }
  0x16   : > { %1684 = shalt.err (!%p1681_p0)
}
  0x17   : > { %s1732_s20 = smov [#allocation3]   ;;  %s1685_s21 = scalar_lea.vmem %s275_s17, 16 }
  0x18   : > { %1608 = dma.vmem_to_smem (!%p1819_p6), %s264_s14, 16, %s1732_s20, [#allocation4]  }
  0x19   : > { %p1686_p1 = scmp.ne.s32.totalorder %s275_s17, %s1685_s21  ;;  %p1693_p4 = scmp.lt.s32.totalorder %s275_s17, %s275_s17 }
  0x1a   : > { %p1694_p3 = scmp.lt.s32.totalorder %s1685_s21, %s1685_s21 }
  0x1b   : > { %p1688_p2 = pnand %p1686_p1, %p1672_p8 }
  0x1c   : > { %p1695_p7 = por %p1694_p3, %p1693_p4 }
  0x1d   : > { %p1689_p5 = pneg %p1688_p2 }
  0x1f   : > { %p1696_p9 = pnand %p1695_p7, %p1689_p5 }
  0x21   : > { %1699 = shalt.err (!%p1696_p9)
}
  0x22   : > { %s1733_s22 = smov [#allocation5]   ;;  %p2067_p10 = scmp.ne.s32.totalorder %s2064_s10, 0 }
  0x23   : > { %1611 = dma.vmem_to_smem (!%p1819_p6), %s275_s17, 16, %s1733_s22, [#allocation6]  }
  0x24   : > { %330 = sbr.rel (%p2067_p10) target bundleno = 858 (0x35a), region = 52  ;;  %p2068_p11 = scmp.ne.s32.totalorder (!%p2067_p10), %s2065_s11, 0 }
  0x2b   : > { %1713 = dma.done.wait (%p2068_p11), [#allocation4], 16  }
  0x2c   : > { %1715 = vsyncadd (%p2068_p11), [#allocation4], 4294967280 }
  0x2d   : > { %1717 = dma.done.wait (%p2068_p11), [#allocation6], 16  }
  0x2e   : > { %1719 = vsyncadd (%p2068_p11), [#allocation6], 4294967280 }
  0x2f   : > { %340 = sfence }
  0x30   : > { %p386_p3 = scmp.lt.s32.totalorder %s1722_s27, 1  ;;  %s414_s23 = sld [smem:[#allocation3 + %s1722_s27]]  ;;  %v1734_v0 = vmov 0   ;;  %v1645_v60 = vld [vmem:[%s2056_s4] sm:$0xff]   ;;  %vm788_vm0 = vcmask 261120   ;;  %vm1359_vm1 = vcmask 0  }
  0x31   : > { %s415_s24 = sld [smem:[#allocation5 + %s1722_s27]]  ;;  %869 = vmatprep.mubr.bf16.mxu0 %v1734_v0  ;;  %1643 = vset.pattern.permute.xlu0 %v1734_v0 }
  0x32   : > { %s2074_s27 = smov (!%p386_p3, %s1722_s27), 1  ;;  %1644 = vset.pattern.permute.xlu1 %v1734_v0 }
  0x33   : > { %s1592_s25 = sshll.u32 %s2074_s27, 6  ;;  %s1594_s15 = sshll.u32 %s2074_s27, 8 }
  0x34   : > { %s393_s10 = scalar_lea.vmem %s2054_s2, %s1592_s25  ;;  %s1855_s13 = scalar_lea.vmem %s2055_s3, %s1592_s25 }
  0x35   : > { %v429_v1 = vld [vmem:[%s393_s10 + $0x8] sm:$0xff]  ;;  %v431_v2 = vld [vmem:[%s393_s10 + $0x18] sm:$0xff]  ;;  %v428_v7 = vld [vmem:[%s393_s10] sm:$0xff]  ;;  %s1884_s18 = scalar_lea.vmem %s2057_s5, %s1594_s15 }
  0x36   : > { %v1858_v3 = vld [vmem:[%s1855_s13 + $0x8] sm:$0xff]  ;;  %s444_s14 = smul.f32 2.0, %s414_s23  ;;  %v1860_v4 = vstv %s414_s23  ;;  %v439_v5 = vld [vmem:[%s1855_s13 + $0x18] sm:$0xff]  ;;  %v430_v8 = vld [vmem:[%s393_s10 + $0x10] sm:$0xff] }
  0x37   : > { %v454_v6 = vstv %s415_s24  ;;  %v1865_v12 = vld [vmem:[%s1855_s13] sm:$0xff]  ;;  %v1868_v13 = vld [vmem:[%s1855_s13 + $0x10] sm:$0xff]  ;;  %v433_v14 = vld [vmem:[%s393_s10 + $0x28] sm:$0xff] }
  0x38   : > { %v445_v9 = vstv %s444_s14  ;;  %v456_v10 = vmul.f32 %v454_v6, %v1858_v3  ;;  %v458_v11 = vmul.f32 %v454_v6, %v439_v5  ;;  %v435_v19 = vld [vmem:[%s393_s10 + $0x38] sm:$0xff]  ;;  %v441_v20 = vld [vmem:[%s1855_s13 + $0x28] sm:$0xff]  ;;  %v455_v22 = vmul.f32 %v454_v6, %v1865_v12  ;;  %v432_v26 = vld [vmem:[%s393_s10 + $0x20] sm:$0xff] }
  0x39   : > { %v447_v15 = vmul.f32 %v445_v9, %v429_v1  ;;  %v449_v16 = vmul.f32 %v445_v9, %v431_v2  ;;  %v446_v17 = vmul.f32 %v445_v9, %v428_v7  ;;  %v448_v18 = vmul.f32 %v445_v9, %v430_v8  ;;  %v443_v21 = vld [vmem:[%s1855_s13 + $0x38] sm:$0xff]  ;;  %v434_v27 = vld [vmem:[%s393_s10 + $0x30] sm:$0xff]  ;;  %v1876_v32 = vld [vmem:[%s1855_s13 + $0x20] sm:$0xff] }
  0x3a   : > { %v457_v23 = vmul.f32 %v454_v6, %v1868_v13  ;;  %v451_v24 = vmul.f32 %v445_v9, %v433_v14  ;;  %v453_v25 = vmul.f32 %v445_v9, %v435_v19  ;;  %v460_v30 = vmul.f32 %v454_v6, %v441_v20  ;;  %v1879_v33 = vld [vmem:[%s1855_s13 + $0x30] sm:$0xff]  ;;  %v516_v52 = vld [vmem:[%s1884_s18] sm:$0xff]  ;;  %v517_v57 = vld [vmem:[%s1884_s18 + $0x8] sm:$0xff] }
  0x3b   : > { %v464_v28 = vadd.f32 %v456_v10, %v447_v15  ;;  %v466_v29 = vadd.f32 %v458_v11, %v449_v16  ;;  %v462_v31 = vmul.f32 %v454_v6, %v443_v21  ;;  %v463_v34 = vadd.f32 %v455_v22, %v446_v17  ;;  %v518_v53 = vld [vmem:[%s1884_s18 + $0x10] sm:$0xff]  ;;  %550 = vperm.xlu0 %1643, %v516_v52   ;;  %v519_v58 = vld [vmem:[%s1884_s18 + $0x18] sm:$0xff]  ;;  %v520_v61 = vld [vmem:[%s1884_s18 + $0x20] sm:$0xff] }
  0x3c   : > { %v465_v35 = vadd.f32 %v457_v23, %v448_v18  ;;  %v450_v36 = vmul.f32 %v445_v9, %v432_v26  ;;  %v452_v37 = vmul.f32 %v445_v9, %v434_v27  ;;  %v468_v40 = vadd.f32 %v460_v30, %v451_v24  ;;  %560 = vperm.xlu1 %1644, %v518_v53   ;;  %v521_v62 = vld [vmem:[%s1884_s18 + $0x28] sm:$0xff]  ;;  %v522_v63 = vld [vmem:[%s1884_s18 + $0x30] sm:$0xff]  ;;  %v523_v1 = vld [vmem:[%s1884_s18 + $0x38] sm:$0xff] }
  0x3d   : > { %v473_v38 = vsub.f32 %v464_v28, %v1860_v4  ;;  %v475_v39 = vsub.f32 %v466_v29, %v1860_v4  ;;  %v470_v41 = vadd.f32 %v462_v31, %v453_v25  ;;  %v472_v42 = vsub.f32 %v463_v34, %v1860_v4  ;;  %v1646_v2 = vld [vmem:[%s2056_s4 + $0x8] sm:$0xff]   ;;  %v527_v7 = vld [vmem:[%s1884_s18 + $0x58] sm:$0xff]  ;;  %v1647_v8 = vld [vmem:[%s2056_s4 + $0x10] sm:$0xff]  }
  0x3e   : > { %v474_v43 = vsub.f32 %v465_v35, %v1860_v4  ;;  %v459_v44 = vmul.f32 %v454_v6, %v1876_v32  ;;  %v461_v45 = vmul.f32 %v454_v6, %v1879_v33  ;;  %v477_v47 = vsub.f32 %v468_v40, %v1860_v4  ;;  %v525_v5 = vld [vmem:[%s1884_s18 + $0x48] sm:$0xff]  ;;  %v526_v6 = vld [vmem:[%s1884_s18 + $0x50] sm:$0xff]  ;;  %v528_v9 = vld [vmem:[%s1884_s18 + $0x60] sm:$0xff] }
  0x3f   : > { %v513_v46 = vpack.c.bf16 %v475_v39, %v473_v38  ;;  %v479_v48 = vsub.f32 %v470_v41, %v1860_v4  ;;  %555 = vperm.xlu0 %1643, %v517_v57   ;;  %v529_v10 = vld [vmem:[%s1884_s18 + $0x68] sm:$0xff]  ;;  %v530_v11 = vld [vmem:[%s1884_s18 + $0x70] sm:$0xff]  ;;  %v531_v14 = vld [vmem:[%s1884_s18 + $0x78] sm:$0xff] }
  0x40   : > { %v512_v49 = vpack.c.bf16 %v474_v43, %v472_v42  ;;  %v467_v50 = vadd.f32 %v459_v44, %v450_v36  ;;  %v469_v51 = vadd.f32 %v461_v45, %v452_v37  ;;  %565 = vperm.xlu1 %1644, %v519_v58   ;;  %v1648_v15 = vld [vmem:[%s2056_s4 + $0x18] sm:$0xff]   ;;  %v532_v16 = vld [vmem:[%s1884_s18 + $0x80] sm:$0xff]  ;;  %v533_v17 = vld [vmem:[%s1884_s18 + $0x88] sm:$0xff] }
  0x41   : > { %837 = vmatprep.subr.bf16.mxu0 %v513_v46  ;;  %v515_v54 = vpack.c.bf16 %v479_v48, %v477_v47  ;;  %v534_v18 = vld [vmem:[%s1884_s18 + $0x90] sm:$0xff]  ;;  %v535_v19 = vld [vmem:[%s1884_s18 + $0x98] sm:$0xff]  ;;  %v1649_v20 = vld [vmem:[%s2056_s4 + $0x20] sm:$0xff]  }
  0x42   : > { %838 = vmatpush1.bf16.msra.mxu0 %v512_v49  ;;  %v476_v55 = vsub.f32 %v467_v50, %v1860_v4  ;;  %v478_v56 = vsub.f32 %v469_v51, %v1860_v4  ;;  %v524_v4 = vld [vmem:[%s1884_s18 + $0x40] sm:$0xff]  ;;  %v537_v22 = vld [vmem:[%s1884_s18 + $0xa8] sm:$0xff]  ;;  %v538_v23 = vld [vmem:[%s1884_s18 + $0xb0] sm:$0xff] }
  0x43   : > { %839 = vmatprep.subr.bf16.mxu0 %v515_v54  ;;  %570 = vperm.xlu0 %1643, %v520_v61   ;;  %v536_v21 = vld [vmem:[%s1884_s18 + $0xa0] sm:$0xff]  ;;  %v539_v24 = vld [vmem:[%s1884_s18 + $0xb8] sm:$0xff]  ;;  %v1650_v25 = vld [vmem:[%s2056_s4 + $0x28] sm:$0xff]  }
  0x44   : > { %v514_v59 = vpack.c.bf16 %v478_v56, %v476_v55  ;;  %575 = vperm.xlu1 %1644, %v521_v62   ;;  %v540_v26 = vld [vmem:[%s1884_s18 + $0xc0] sm:$0xff]  ;;  %v541_v27 = vld [vmem:[%s1884_s18 + $0xc8] sm:$0xff]  ;;  %v542_v28 = vld [vmem:[%s1884_s18 + $0xd0] sm:$0xff] }
  0x45   : > { %v543_v29 = vld [vmem:[%s1884_s18 + $0xd8] sm:$0xff]  ;;  %v1651_v30 = vld [vmem:[%s2056_s4 + $0x30] sm:$0xff]   ;;  %v544_v31 = vld [vmem:[%s1884_s18 + $0xe0] sm:$0xff] }
  0x46   : > { %840 = vmatpush1.bf16.msra.mxu0 %v514_v59  ;;  %v545_v34 = vld [vmem:[%s1884_s18 + $0xe8] sm:$0xff]  ;;  %v546_v35 = vld [vmem:[%s1884_s18 + $0xf0] sm:$0xff]  ;;  %v547_v36 = vld [vmem:[%s1884_s18 + $0xf8] sm:$0xff] }
  0x47   : > { %580 = vperm.xlu0 %1643, %v522_v63   ;;  %v1652_v37 = vld [vmem:[%s2056_s4 + $0x38] sm:$0xff]   ;;  %v1194_v38 = vld [vmem:[%s2059_s7] sm:$0xff]  ;;  %v1195_v39 = vld [vmem:[%s2059_s7 + $0x8] sm:$0xff] }
  0x48   : > { %585 = vperm.xlu1 %1644, %v523_v1   ;;  %v1196_v40 = vld [vmem:[%s2059_s7 + $0x10] sm:$0xff]  ;;  %v1197_v41 = vld [vmem:[%s2059_s7 + $0x18] sm:$0xff]  ;;  %v1653_v42 = vld [vmem:[%s2056_s4 + $0x40] sm:$0xff]  }
  0x49   : > { %1506 = vmatmul.mubr.msk.bf16.vlgmr.msra.gmra.mrb[0].mxu0 %vm788_vm0, %v1645_v60  ;;  %v1654_v43 = vld [vmem:[%s2056_s4 + $0x48] sm:$0xff]   ;;  %v1655_v44 = vld [vmem:[%s2056_s4 + $0x50] sm:$0xff]   ;;  %v1656_v45 = vld [vmem:[%s2056_s4 + $0x58] sm:$0xff]  }
  0x4a   : > { %879 = vmatprep.mubr.bf16.mxu0 %v1734_v0  ;;  %v1657_v46 = vld [vmem:[%s2056_s4 + $0x60] sm:$0xff]   ;;  %v1658_v47 = vld [vmem:[%s2056_s4 + $0x68] sm:$0xff]   ;;  %v1659_v48 = vld [vmem:[%s2056_s4 + $0x70] sm:$0xff]  }
  0x4b   : > { %590 = vperm.xlu0 %1643, %v524_v4   ;;  %v1660_v49 = vld [vmem:[%s2056_s4 + $0x78] sm:$0xff]   ;;  %v1663_v59 = vld [vmem:[%s2058_s6 + $0x4] ss:$8 sps:$4 sm:$0xff]  }
  0x4c   : > { %595 = vperm.xlu1 %1644, %v525_v5   ;;  %1270 = vmatprep.mubr.bf16.mxu1 %v1663_v59 }
  0x4f   : > { %600 = vperm.xlu0 %1643, %v526_v6  }
  0x50   : > { %605 = vperm.xlu1 %1644, %v527_v7  }
  0x51   : > { %1507 = vmatmul.mubr.msk.bf16.gmra.mrb[4].mxu0 %vm788_vm0, %v1646_v2 }
  0x52   : > { %889 = vmatprep.mubr.bf16.mxu0 %v1734_v0 }
  0x53   : > { %610 = vperm.xlu0 %1643, %v528_v9  }
  0x54   : > { %615 = vperm.xlu1 %1644, %v529_v10  }
  0x57   : > { %620 = vperm.xlu0 %1643, %v530_v11  }
  0x58   : > { %625 = vperm.xlu1 %1644, %v531_v14  }
  0x59   : > { %1508 = vmatmul.mubr.msk.bf16.gmra.mrb[8].mxu0 %vm788_vm0, %v1647_v8 }
  0x5a   : > { %899 = vmatprep.mubr.bf16.mxu0 %v1734_v0 }
  0x5b   : > { %630 = vperm.xlu0 %1643, %v532_v16  }
  0x5c   : > { %635 = vperm.xlu1 %1644, %v533_v17  }
  0x5f   : > { %640 = vperm.xlu0 %1643, %v534_v18  }
  0x60   : > { %645 = vperm.xlu1 %1644, %v535_v19  }
  0x61   : > { %1509 = vmatmul.mubr.msk.bf16.gmra.mrb[12].mxu0 %vm788_vm0, %v1648_v15 }
  0x62   : > { %909 = vmatprep.mubr.bf16.mxu0 %v1734_v0 }
  0x63   : > { %650 = vperm.xlu0 %1643, %v536_v21  }
  0x64   : > { %655 = vperm.xlu1 %1644, %v537_v22  }
  0x67   : > { %660 = vperm.xlu0 %1643, %v538_v23  }
  0x68   : > { %665 = vperm.xlu1 %1644, %v539_v24  }
  0x69   : > { %1510 = vmatmul.mubr.msk.bf16.gmra.mrb[16].mxu0 %vm788_vm0, %v1649_v20 }
  0x6a   : > { %919 = vmatprep.mubr.bf16.mxu0 %v1734_v0 }
  0x6b   : > { %670 = vperm.xlu0 %1643, %v540_v26  }
  0x6c   : > { %675 = vperm.xlu1 %1644, %v541_v27  }
  0x6f   : > { %680 = vperm.xlu0 %1643, %v542_v28  }
  0x70   : > { %685 = vperm.xlu1 %1644, %v543_v29  }
  0x71   : > { %1511 = vmatmul.mubr.msk.bf16.gmra.mrb[20].mxu0 %vm788_vm0, %v1650_v25 }
  0x72   : > { %929 = vmatprep.mubr.bf16.mxu0 %v1734_v0 }
  0x73   : > { %690 = vperm.xlu0 %1643, %v544_v31  }
  0x74   : > { %695 = vperm.xlu1 %1644, %v545_v34  }
  0x77   : > { %700 = vperm.xlu0 %1643, %v546_v35  }
  0x78   : > { %705 = vperm.xlu1 %1644, %v547_v36  }
  0x79   : > { %1512 = vmatmul.mubr.msk.bf16.gmra.mrb[24].mxu0 %vm788_vm0, %v1651_v30 }
  0x7a   : > { %939 = vmatprep.mubr.bf16.mxu0 %v1734_v0 }
  0x7b   : > { %1200 = vperm.xlu0 %1643, %v1194_v38  }
  0x7c   : > { %1205 = vperm.xlu1 %1644, %v1195_v39  }
  0x7f   : > { %1210 = vperm.xlu0 %1643, %v1196_v40  }
  0x80   : > { %1215 = vperm.xlu1 %1644, %v1197_v41  }
  0x81   : > { %1513 = vmatmul.mubr.msk.bf16.gmra.mrb[28].mxu0 %vm788_vm0, %v1652_v37 }
  0x82   : > { %949 = vmatprep.mubr.bf16.mxu0 %v1734_v0 }
  0x89   : > { %1514 = vmatmul.mubr.msk.bf16.gmra.mrb[32].mxu0 %vm788_vm0, %v1653_v42 }
  0x8a   : > { %959 = vmatprep.mubr.bf16.mxu0 %v1734_v0 }
  0x91   : > { %1515 = vmatmul.mubr.msk.bf16.gmra.mrb[36].mxu0 %vm788_vm0, %v1654_v43 }
  0x92   : > { %969 = vmatprep.mubr.bf16.mxu0 %v1734_v0 }
  0x99   : > { %1516 = vmatmul.mubr.msk.bf16.gmra.mrb[40].mxu0 %vm788_vm0, %v1655_v44 }
  0x9a   : > { %979 = vmatprep.mubr.bf16.mxu0 %v1734_v0 }
  0xa1   : > { %1517 = vmatmul.mubr.msk.bf16.gmra.mrb[44].mxu0 %vm788_vm0, %v1656_v45 }
  0xa2   : > { %989 = vmatprep.mubr.bf16.mxu0 %v1734_v0 }
  0xa9   : > { %1518 = vmatmul.mubr.msk.bf16.gmra.mrb[48].mxu0 %vm788_vm0, %v1657_v46 }
  0xaa   : > { %999 = vmatprep.mubr.bf16.mxu0 %v1734_v0 }
  0xb1   : > { %1519 = vmatmul.mubr.msk.bf16.gmra.mrb[52].mxu0 %vm788_vm0, %v1658_v47 }
  0xb2   : > { %1009 = vmatprep.mubr.bf16.mxu0 %v1734_v0 }
  0xb9   : > { %1520 = vmatmul.mubr.msk.bf16.gmra.mrb[56].mxu0 %vm788_vm0, %v1659_v48 }
  0xba   : > { %1019 = vmatprep.mubr.bf16.mxu0 %v1734_v0  ;;  %v551_v50 = vpop.permute.xlu0 %550 }
  0xbb   : > { %v561_v0 = vpop.permute.xlu1 %560 }
  0xbe   : > { %v556_v54 = vpop.permute.xlu0 %555 }
  0xbf   : > { %v566_v8 = vpop.permute.xlu1 %565 }
  0xc1   : > { %1521 = vmatmul.mubr.msk.bf16.gmra.mrb[60].mxu0 %vm788_vm0, %v1660_v49 }
  0xc2   : > { %v571_v21 = vpop.permute.xlu0 %570 }
  0xc3   : > { %v576_v26 = vpop.permute.xlu1 %575 }
  0xc6   : > { %v581_v39 = vpop.permute.xlu0 %580 }
  0xc7   : > { %v586_v44 = vpop.permute.xlu1 %585 }
 0x11c   : > { %v871_v51 = vpop.f32.mrb[0].mxu0 }
 0x11d   : > { %v872_v52 = vadd.f32 %v871_v51, %v551_v50  ;;  %v873_v53 = vpop.f32.mrb[1].mxu0 }
 0x11e   : > { %v874_v55 = vadd.f32 %v873_v53, %v551_v50  ;;  %v875_v56 = vpop.f32.mrb[2].mxu0 }
 0x11f   : > { %v876_v57 = vadd.f32 %v875_v56, %v556_v54  ;;  %v877_v58 = vpop.f32.mrb[3].mxu0  ;;  %v1522_v61 = vclamps-f32 %v872_v52, 1.0 }
 0x120   : > { %v878_v60 = vadd.f32 %v877_v58, %v556_v54  ;;  %v1523_v63 = vclamps-f32 %v874_v55, 1.0  ;;  %v591_v55 = vpop.permute.xlu0 %590 }
 0x121   : > { %v1524_v62 = vclamps-f32 %v876_v57, 1.0 }
 0x122   : > { %v1525_v1 = vclamps-f32 %v878_v60, 1.0 }
 0x123   : > { %v1162_v2 = vpack.c.bf16 %v1524_v62, %v1522_v61 }
 0x124   : > { %v881_v4 = vpop.f32.mrb[4].mxu0  ;;  %v1163_v5 = vpack.c.bf16 %v1525_v1, %v1523_v63 }
 0x125   : > { %v882_v6 = vadd.f32 %v881_v4, %v561_v0  ;;  %v883_v7 = vpop.f32.mrb[5].mxu0 }
 0x126   : > { %v884_v9 = vadd.f32 %v883_v7, %v561_v0  ;;  %v885_v10 = vpop.f32.mrb[6].mxu0  ;;  %1238 = vmatprep.subr.bf16.mxu1 %v1163_v5  ;;  %v596_v0 = vpop.permute.xlu1 %595 }
 0x127   : > { %v886_v11 = vadd.f32 %v885_v10, %v566_v8  ;;  %v887_v14 = vpop.f32.mrb[7].mxu0  ;;  %1239 = vmatpush1.bf16.msra.mxu1 %v1162_v2  ;;  %v1526_v16 = vclamps-f32 %v882_v6, 1.0 }
 0x128   : > { %v888_v15 = vadd.f32 %v887_v14, %v566_v8  ;;  %v1527_v18 = vclamps-f32 %v884_v9, 1.0  ;;  %v601_v8 = vpop.permute.xlu0 %600 }
 0x129   : > { %v1528_v17 = vclamps-f32 %v886_v11, 1.0 }
 0x12a   : > { %v1529_v19 = vclamps-f32 %v888_v15, 1.0  ;;  %v606_v15 = vpop.permute.xlu1 %605 }
 0x12b   : > { %v1164_v20 = vpack.c.bf16 %v1528_v17, %v1526_v16 }
 0x12c   : > { %v1165_v22 = vpack.c.bf16 %v1529_v19, %v1527_v18  ;;  %v891_v23 = vpop.f32.mrb[8].mxu0 }
 0x12d   : > { %v892_v24 = vadd.f32 %v891_v23, %v571_v21  ;;  %v893_v25 = vpop.f32.mrb[9].mxu0 }
 0x12e   : > { %v894_v27 = vadd.f32 %v893_v25, %v571_v21  ;;  %v895_v28 = vpop.f32.mrb[10].mxu0  ;;  %1240 = vmatprep.subr.bf16.mxu1 %v1165_v22 }
 0x12f   : > { %v896_v29 = vadd.f32 %v895_v28, %v576_v26  ;;  %v897_v30 = vpop.f32.mrb[11].mxu0  ;;  %1241 = vmatpush1.bf16.msra.mxu1 %v1164_v20  ;;  %v1530_v34 = vclamps-f32 %v892_v24, 1.0 }
 0x130   : > { %v898_v31 = vadd.f32 %v897_v30, %v576_v26  ;;  %v1531_v36 = vclamps-f32 %v894_v27, 1.0  ;;  %v611_v26 = vpop.permute.xlu0 %610 }
 0x131   : > { %v1532_v35 = vclamps-f32 %v896_v29, 1.0 }
 0x132   : > { %v1533_v37 = vclamps-f32 %v898_v31, 1.0  ;;  %v616_v31 = vpop.permute.xlu1 %615 }
 0x133   : > { %v1166_v38 = vpack.c.bf16 %v1532_v35, %v1530_v34 }
 0x134   : > { %v1167_v40 = vpack.c.bf16 %v1533_v37, %v1531_v36  ;;  %v901_v41 = vpop.f32.mrb[12].mxu0 }
 0x135   : > { %v902_v42 = vadd.f32 %v901_v41, %v581_v39  ;;  %v903_v43 = vpop.f32.mrb[13].mxu0 }
 0x136   : > { %v904_v45 = vadd.f32 %v903_v43, %v581_v39  ;;  %v905_v46 = vpop.f32.mrb[14].mxu0  ;;  %1242 = vmatprep.subr.bf16.mxu1 %v1167_v40 }
 0x137   : > { %v906_v47 = vadd.f32 %v905_v46, %v586_v44  ;;  %v907_v48 = vpop.f32.mrb[15].mxu0  ;;  %1243 = vmatpush1.bf16.msra.mxu1 %v1166_v38  ;;  %v1534_v50 = vclamps-f32 %v902_v42, 1.0 }
 0x138   : > { %v908_v49 = vadd.f32 %v907_v48, %v586_v44  ;;  %v1535_v52 = vclamps-f32 %v904_v45, 1.0  ;;  %v621_v44 = vpop.permute.xlu0 %620 }
 0x139   : > { %v1536_v51 = vclamps-f32 %v906_v47, 1.0 }
 0x13a   : > { %v1537_v53 = vclamps-f32 %v908_v49, 1.0  ;;  %v626_v49 = vpop.permute.xlu1 %625 }
 0x13b   : > { %v1168_v54 = vpack.c.bf16 %v1536_v51, %v1534_v50 }
 0x13c   : > { %v1169_v56 = vpack.c.bf16 %v1537_v53, %v1535_v52  ;;  %v911_v57 = vpop.f32.mrb[16].mxu0 }
 0x13d   : > { %v912_v58 = vadd.f32 %v911_v57, %v591_v55  ;;  %v913_v59 = vpop.f32.mrb[17].mxu0 }
 0x13e   : > { %v914_v60 = vadd.f32 %v913_v59, %v591_v55  ;;  %v915_v61 = vpop.f32.mrb[18].mxu0  ;;  %1244 = vmatprep.subr.bf16.mxu1 %v1169_v56 }
 0x13f   : > { %v916_v62 = vadd.f32 %v915_v61, %v596_v0  ;;  %v917_v63 = vpop.f32.mrb[19].mxu0  ;;  %1245 = vmatpush1.bf16.msra.mxu1 %v1168_v54  ;;  %v1538_v2 = vclamps-f32 %v912_v58, 1.0 }
 0x140   : > { %v918_v1 = vadd.f32 %v917_v63, %v596_v0  ;;  %v1539_v5 = vclamps-f32 %v914_v60, 1.0  ;;  %v631_v0 = vpop.permute.xlu0 %630 }
 0x141   : > { %v1540_v4 = vclamps-f32 %v916_v62, 1.0 }
 0x142   : > { %v1541_v6 = vclamps-f32 %v918_v1, 1.0  ;;  %v636_v1 = vpop.permute.xlu1 %635 }
 0x143   : > { %v1170_v7 = vpack.c.bf16 %v1540_v4, %v1538_v2 }
 0x144   : > { %v1171_v9 = vpack.c.bf16 %v1541_v6, %v1539_v5  ;;  %v921_v10 = vpop.f32.mrb[20].mxu0 }
 0x145   : > { %v922_v11 = vadd.f32 %v921_v10, %v601_v8  ;;  %v923_v14 = vpop.f32.mrb[21].mxu0 }
 0x146   : > { %v924_v16 = vadd.f32 %v923_v14, %v601_v8  ;;  %v925_v17 = vpop.f32.mrb[22].mxu0  ;;  %1246 = vmatprep.subr.bf16.mxu1 %v1171_v9 }
 0x147   : > { %v926_v18 = vadd.f32 %v925_v17, %v606_v15  ;;  %v927_v19 = vpop.f32.mrb[23].mxu0  ;;  %1247 = vmatpush1.bf16.msra.mxu1 %v1170_v7  ;;  %v1542_v21 = vclamps-f32 %v922_v11, 1.0 }
 0x148   : > { %v928_v20 = vadd.f32 %v927_v19, %v606_v15  ;;  %v1543_v23 = vclamps-f32 %v924_v16, 1.0  ;;  %v641_v15 = vpop.permute.xlu0 %640 }
 0x149   : > { %v1544_v22 = vclamps-f32 %v926_v18, 1.0 }
 0x14a   : > { %v1545_v24 = vclamps-f32 %v928_v20, 1.0  ;;  %v646_v20 = vpop.permute.xlu1 %645 }
 0x14b   : > { %v1172_v25 = vpack.c.bf16 %v1544_v22, %v1542_v21 }
 0x14c   : > { %v1173_v27 = vpack.c.bf16 %v1545_v24, %v1543_v23  ;;  %v931_v28 = vpop.f32.mrb[24].mxu0 }
 0x14d   : > { %v932_v29 = vadd.f32 %v931_v28, %v611_v26  ;;  %v933_v30 = vpop.f32.mrb[25].mxu0 }
 0x14e   : > { %v934_v34 = vadd.f32 %v933_v30, %v611_v26  ;;  %v935_v35 = vpop.f32.mrb[26].mxu0  ;;  %1248 = vmatprep.subr.bf16.mxu1 %v1173_v27 }
 0x14f   : > { %v936_v36 = vadd.f32 %v935_v35, %v616_v31  ;;  %v937_v37 = vpop.f32.mrb[27].mxu0  ;;  %1249 = vmatpush1.bf16.msra.mxu1 %v1172_v25  ;;  %v1546_v39 = vclamps-f32 %v932_v29, 1.0 }
 0x150   : > { %v938_v38 = vadd.f32 %v937_v37, %v616_v31  ;;  %v1547_v41 = vclamps-f32 %v934_v34, 1.0  ;;  %v651_v31 = vpop.permute.xlu0 %650 }
 0x151   : > { %v1548_v40 = vclamps-f32 %v936_v36, 1.0 }
 0x152   : > { %v1549_v42 = vclamps-f32 %v938_v38, 1.0  ;;  %v656_v38 = vpop.permute.xlu1 %655 }
 0x153   : > { %v1174_v43 = vpack.c.bf16 %v1548_v40, %v1546_v39 }
 0x154   : > { %v1175_v45 = vpack.c.bf16 %v1549_v42, %v1547_v41  ;;  %v941_v46 = vpop.f32.mrb[28].mxu0 }
 0x155   : > { %v942_v47 = vadd.f32 %v941_v46, %v621_v44  ;;  %v943_v48 = vpop.f32.mrb[29].mxu0 }
 0x156   : > { %v944_v50 = vadd.f32 %v943_v48, %v621_v44  ;;  %v945_v51 = vpop.f32.mrb[30].mxu0  ;;  %1250 = vmatprep.subr.bf16.mxu1 %v1175_v45 }
 0x157   : > { %v946_v52 = vadd.f32 %v945_v51, %v626_v49  ;;  %v947_v53 = vpop.f32.mrb[31].mxu0  ;;  %1251 = vmatpush1.bf16.msra.mxu1 %v1174_v43  ;;  %v1550_v55 = vclamps-f32 %v942_v47, 1.0 }
 0x158   : > { %v948_v54 = vadd.f32 %v947_v53, %v626_v49  ;;  %v1551_v57 = vclamps-f32 %v944_v50, 1.0  ;;  %v661_v49 = vpop.permute.xlu0 %660 }
 0x159   : > { %v1552_v56 = vclamps-f32 %v946_v52, 1.0 }
 0x15a   : > { %v1553_v58 = vclamps-f32 %v948_v54, 1.0  ;;  %v666_v54 = vpop.permute.xlu1 %665 }
 0x15b   : > { %v1176_v59 = vpack.c.bf16 %v1552_v56, %v1550_v55 }
 0x15c   : > { %v1177_v60 = vpack.c.bf16 %v1553_v58, %v1551_v57  ;;  %v951_v61 = vpop.f32.mrb[32].mxu0 }
 0x15d   : > { %v952_v62 = vadd.f32 %v951_v61, %v631_v0  ;;  %v953_v63 = vpop.f32.mrb[33].mxu0 }
 0x15e   : > { %v954_v2 = vadd.f32 %v953_v63, %v631_v0  ;;  %v955_v4 = vpop.f32.mrb[34].mxu0  ;;  %1252 = vmatprep.subr.bf16.mxu1 %v1177_v60 }
 0x15f   : > { %v956_v5 = vadd.f32 %v955_v4, %v636_v1  ;;  %v957_v6 = vpop.f32.mrb[35].mxu0  ;;  %1253 = vmatpush1.bf16.msra.mxu1 %v1176_v59  ;;  %v1554_v8 = vclamps-f32 %v952_v62, 1.0 }
 0x160   : > { %v958_v7 = vadd.f32 %v957_v6, %v636_v1  ;;  %v1555_v10 = vclamps-f32 %v954_v2, 1.0  ;;  %v671_v1 = vpop.permute.xlu0 %670 }
 0x161   : > { %v1556_v9 = vclamps-f32 %v956_v5, 1.0 }
 0x162   : > { %v1557_v11 = vclamps-f32 %v958_v7, 1.0  ;;  %v676_v7 = vpop.permute.xlu1 %675 }
 0x163   : > { %v1178_v14 = vpack.c.bf16 %v1556_v9, %v1554_v8 }
 0x164   : > { %v1179_v16 = vpack.c.bf16 %v1557_v11, %v1555_v10  ;;  %v961_v17 = vpop.f32.mrb[36].mxu0 }
 0x165   : > { %v962_v18 = vadd.f32 %v961_v17, %v641_v15  ;;  %v963_v19 = vpop.f32.mrb[37].mxu0 }
 0x166   : > { %v964_v21 = vadd.f32 %v963_v19, %v641_v15  ;;  %v965_v22 = vpop.f32.mrb[38].mxu0  ;;  %1254 = vmatprep.subr.bf16.mxu1 %v1179_v16 }
 0x167   : > { %v966_v23 = vadd.f32 %v965_v22, %v646_v20  ;;  %v967_v24 = vpop.f32.mrb[39].mxu0  ;;  %1255 = vmatpush1.bf16.msra.mxu1 %v1178_v14  ;;  %v1558_v26 = vclamps-f32 %v962_v18, 1.0 }
 0x168   : > { %v968_v25 = vadd.f32 %v967_v24, %v646_v20  ;;  %v1559_v28 = vclamps-f32 %v964_v21, 1.0  ;;  %v681_v20 = vpop.permute.xlu0 %680 }
 0x169   : > { %v1560_v27 = vclamps-f32 %v966_v23, 1.0 }
 0x16a   : > { %v1561_v29 = vclamps-f32 %v968_v25, 1.0  ;;  %v686_v25 = vpop.permute.xlu1 %685 }
 0x16b   : > { %v1180_v30 = vpack.c.bf16 %v1560_v27, %v1558_v26 }
 0x16c   : > { %v1181_v34 = vpack.c.bf16 %v1561_v29, %v1559_v28  ;;  %v971_v35 = vpop.f32.mrb[40].mxu0 }
 0x16d   : > { %v972_v36 = vadd.f32 %v971_v35, %v651_v31  ;;  %v973_v37 = vpop.f32.mrb[41].mxu0 }
 0x16e   : > { %v974_v39 = vadd.f32 %v973_v37, %v651_v31  ;;  %v975_v40 = vpop.f32.mrb[42].mxu0  ;;  %1256 = vmatprep.subr.bf16.mxu1 %v1181_v34 }
 0x16f   : > { %v976_v41 = vadd.f32 %v975_v40, %v656_v38  ;;  %v977_v42 = vpop.f32.mrb[43].mxu0  ;;  %1257 = vmatpush1.bf16.msra.mxu1 %v1180_v30  ;;  %v1562_v44 = vclamps-f32 %v972_v36, 1.0 }
 0x170   : > { %v978_v43 = vadd.f32 %v977_v42, %v656_v38  ;;  %v1563_v46 = vclamps-f32 %v974_v39, 1.0  ;;  %v691_v38 = vpop.permute.xlu0 %690 }
 0x171   : > { %v1564_v45 = vclamps-f32 %v976_v41, 1.0 }
 0x172   : > { %v1565_v47 = vclamps-f32 %v978_v43, 1.0  ;;  %v696_v43 = vpop.permute.xlu1 %695 }
 0x173   : > { %v1182_v48 = vpack.c.bf16 %v1564_v45, %v1562_v44 }
 0x174   : > { %v1183_v50 = vpack.c.bf16 %v1565_v47, %v1563_v46  ;;  %v981_v51 = vpop.f32.mrb[44].mxu0 }
 0x175   : > { %v982_v52 = vadd.f32 %v981_v51, %v661_v49  ;;  %v983_v53 = vpop.f32.mrb[45].mxu0 }
 0x176   : > { %v984_v55 = vadd.f32 %v983_v53, %v661_v49  ;;  %v985_v56 = vpop.f32.mrb[46].mxu0  ;;  %1258 = vmatprep.subr.bf16.mxu1 %v1183_v50 }
 0x177   : > { %v986_v57 = vadd.f32 %v985_v56, %v666_v54  ;;  %v987_v58 = vpop.f32.mrb[47].mxu0  ;;  %1259 = vmatpush1.bf16.msra.mxu1 %v1182_v48  ;;  %v1566_v0 = vclamps-f32 %v982_v52, 1.0 }
 0x178   : > { %v988_v59 = vadd.f32 %v987_v58, %v666_v54  ;;  %v1567_v61 = vclamps-f32 %v984_v55, 1.0  ;;  %v701_v54 = vpop.permute.xlu0 %700 }
 0x179   : > { %v1568_v60 = vclamps-f32 %v986_v57, 1.0 }
 0x17a   : > { %v1569_v62 = vclamps-f32 %v988_v59, 1.0  ;;  %v706_v59 = vpop.permute.xlu1 %705 }
 0x17b   : > { %v1184_v63 = vpack.c.bf16 %v1568_v60, %v1566_v0 }
 0x17c   : > { %v1185_v2 = vpack.c.bf16 %v1569_v62, %v1567_v61  ;;  %v991_v4 = vpop.f32.mrb[48].mxu0 }
 0x17d   : > { %v992_v5 = vadd.f32 %v991_v4, %v671_v1  ;;  %v993_v6 = vpop.f32.mrb[49].mxu0 }
 0x17e   : > { %v994_v8 = vadd.f32 %v993_v6, %v671_v1  ;;  %v995_v9 = vpop.f32.mrb[50].mxu0  ;;  %1260 = vmatprep.subr.bf16.mxu1 %v1185_v2 }
 0x17f   : > { %v996_v10 = vadd.f32 %v995_v9, %v676_v7  ;;  %v997_v11 = vpop.f32.mrb[51].mxu0  ;;  %1261 = vmatpush1.bf16.msra.mxu1 %v1184_v63  ;;  %v1570_v15 = vclamps-f32 %v992_v5, 1.0  ;;  %v1664_v9 = vld [vmem:[%s2058_s6 + $0x14] ss:$8 sps:$4 sm:$0xff]  }
 0x180   : > { %v998_v14 = vadd.f32 %v997_v11, %v676_v7  ;;  %v1571_v17 = vclamps-f32 %v994_v8, 1.0  ;;  %v1661_v8 = vld [vmem:[%s2058_s6] ss:$8 sps:$4 sm:$0xff]   ;;  %v1201_v11 = vpop.permute.xlu0 %1200 }
 0x181   : > { %v1572_v16 = vclamps-f32 %v996_v10, 1.0  ;;  %v1666_v10 = vld [vmem:[%s2058_s6 + $0x10] ss:$8 sps:$4 sm:$0xff]  }
 0x182   : > { %v1573_v18 = vclamps-f32 %v998_v14, 1.0 }
 0x183   : > { %v1186_v19 = vpack.c.bf16 %v1572_v16, %v1570_v15 }
 0x184   : > { %v1187_v21 = vpack.c.bf16 %v1573_v18, %v1571_v17  ;;  %v1001_v22 = vpop.f32.mrb[52].mxu0  ;;  %v1206_v17 = vpop.permute.xlu1 %1205 }
 0x185   : > { %v1002_v23 = vadd.f32 %v1001_v22, %v681_v20  ;;  %v1003_v24 = vpop.f32.mrb[53].mxu0 }
 0x186   : > { %v1004_v26 = vadd.f32 %v1003_v24, %v681_v20  ;;  %v1005_v27 = vpop.f32.mrb[54].mxu0  ;;  %1262 = vmatprep.subr.bf16.mxu1 %v1187_v21 }
 0x187   : > { %v1006_v28 = vadd.f32 %v1005_v27, %v686_v25  ;;  %v1007_v29 = vpop.f32.mrb[55].mxu0  ;;  %1263 = vmatpush1.bf16.msra.mxu1 %v1186_v19  ;;  %v1574_v31 = vclamps-f32 %v1002_v23, 1.0 }
 0x188   : > { %v1008_v30 = vadd.f32 %v1007_v29, %v686_v25  ;;  %v1575_v35 = vclamps-f32 %v1004_v26, 1.0 }
 0x189   : > { %v1576_v34 = vclamps-f32 %v1006_v28, 1.0  ;;  %v1667_v28 = vld [vmem:[%s1855_s13 + $0x18] sm:$0xff] }
 0x18a   : > { %v1577_v36 = vclamps-f32 %v1008_v30, 1.0 }
 0x18b   : > { %v1188_v37 = vpack.c.bf16 %v1576_v34, %v1574_v31  ;;  %v1211_v31 = vpop.permute.xlu0 %1210 }
 0x18c   : > { %v1189_v39 = vpack.c.bf16 %v1577_v36, %v1575_v35  ;;  %v1011_v40 = vpop.f32.mrb[56].mxu0 }
 0x18d   : > { %v1012_v41 = vadd.f32 %v1011_v40, %v691_v38  ;;  %v1013_v42 = vpop.f32.mrb[57].mxu0 }
 0x18e   : > { %v1014_v44 = vadd.f32 %v1013_v42, %v691_v38  ;;  %v1015_v45 = vpop.f32.mrb[58].mxu0  ;;  %1264 = vmatprep.subr.bf16.mxu1 %v1189_v39  ;;  %v1216_v38 = vpop.permute.xlu1 %1215 }
 0x18f   : > { %v1016_v46 = vadd.f32 %v1015_v45, %v696_v43  ;;  %v1017_v47 = vpop.f32.mrb[59].mxu0  ;;  %1265 = vmatpush1.bf16.msra.mxu1 %v1188_v37  ;;  %v1578_v49 = vclamps-f32 %v1012_v41, 1.0 }
 0x190   : > { %v1018_v48 = vadd.f32 %v1017_v47, %v696_v43  ;;  %v1579_v51 = vclamps-f32 %v1014_v44, 1.0  ;;  %v1668_v44 = vld [vmem:[%s1855_s13 + $0x28] sm:$0xff] }
 0x191   : > { %v1580_v50 = vclamps-f32 %v1016_v46, 1.0 }
 0x192   : > { %v1581_v52 = vclamps-f32 %v1018_v48, 1.0 }
 0x193   : > { %v1190_v53 = vpack.c.bf16 %v1580_v50, %v1578_v49 }
 0x194   : > { %v1191_v55 = vpack.c.bf16 %v1581_v52, %v1579_v51  ;;  %v1021_v56 = vpop.f32.mrb[60].mxu0  ;;  %v1669_v51 = vld [vmem:[%s1855_s13 + $0x38] sm:$0xff]  ;;  %s412_s13 = scalar_lea.vmem %s2060_s8, %s2074_s27 }
 0x195   : > { %v1022_v57 = vadd.f32 %v1021_v56, %v701_v54  ;;  %v1023_v58 = vpop.f32.mrb[61].mxu0 }
 0x196   : > { %v1024_v0 = vadd.f32 %v1023_v58, %v701_v54  ;;  %v1025_v60 = vpop.f32.mrb[62].mxu0  ;;  %1266 = vmatprep.subr.bf16.mxu1 %v1191_v55 }
 0x197   : > { %v1026_v61 = vadd.f32 %v1025_v60, %v706_v59  ;;  %v1027_v62 = vpop.f32.mrb[63].mxu0  ;;  %1267 = vmatpush1.bf16.msra.mxu1 %v1190_v53  ;;  %v1582_v1 = vclamps-f32 %v1022_v57, 1.0 }
 0x198   : > { %v1028_v63 = vadd.f32 %v1027_v62, %v706_v59  ;;  %v1583_v4 = vclamps-f32 %v1024_v0, 1.0 }
 0x199   : > { %v1584_v2 = vclamps-f32 %v1026_v61, 1.0 }
 0x19a   : > { %v1585_v5 = vclamps-f32 %v1028_v63, 1.0 }
 0x19b   : > { %v1192_v6 = vpack.c.bf16 %v1584_v2, %v1582_v1 }
 0x19c   : > { %v1193_v7 = vpack.c.bf16 %v1585_v5, %v1583_v4 }
 0x19e   : > { %1268 = vmatprep.subr.bf16.mxu1 %v1193_v7 }
 0x19f   : > { %1269 = vmatpush1.bf16.msra.mxu1 %v1192_v6 }
 0x1a2   : > { %1271 = vmatmul.mubr.bf16.vlgmr.msra.gmra.mrb[0].mxu1 %v1661_v8 }
 0x1a3   : > { %1280 = vmatprep.mubr.bf16.mxu1 %v1664_v9 }
 0x1aa   : > { %1281 = vmatmul.mubr.bf16.gmra.mrb[4].mxu1 %v1666_v10 }
 0x275   : > { %v1272_v14 = vpop.f32.mrb[0].mxu1 }
 0x276   : > { %v1273_v15 = vadd.f32 %v1272_v14, %v1201_v11  ;;  %v1274_v16 = vpop.f32.mrb[1].mxu1 }
 0x277   : > { %v1275_v18 = vadd.f32 %v1274_v16, %v1201_v11  ;;  %v1276_v19 = vpop.f32.mrb[2].mxu1 }
 0x278   : > { %v1291_v20 = vsub.f32 %v1865_v12, %v1273_v15  ;;  %v1277_v21 = vadd.f32 %v1276_v19, %v1206_v17  ;;  %v1278_v22 = vpop.f32.mrb[3].mxu1 }
 0x279   : > { %v1292_v23 = vsub.f32 %v1858_v3, %v1275_v18  ;;  %v1279_v24 = vadd.f32 %v1278_v22, %v1206_v17 }
 0x27a   : > { %v1299_v25 = vand.u32 2147483647, %v1291_v20  ;;  %v1293_v26 = vsub.f32 %v1868_v13, %v1277_v21 }
 0x27b   : > { %v1300_v27 = vand.u32 2147483647, %v1292_v23  ;;  %v1294_v29 = vsub.f32 %v1667_v28, %v1279_v24 }
 0x27c   : > { %v1301_v30 = vand.u32 2147483647, %v1293_v26 }
 0x27d   : > { %v1342_v34 = vadd.f32 %v1300_v27, %v1299_v25  ;;  %v1282_v35 = vpop.f32.mrb[4].mxu1  ;;  %v1302_v39 = vand.u32 2147483647, %v1294_v29 }
 0x27e   : > { %v1283_v36 = vadd.f32 %v1282_v35, %v1211_v31  ;;  %v1284_v37 = vpop.f32.mrb[5].mxu1 }
 0x27f   : > { %v1343_v12 = vadd.f32 %v1342_v34, %v1301_v30  ;;  %v1285_v40 = vadd.f32 %v1284_v37, %v1211_v31  ;;  %v1286_v3 = vpop.f32.mrb[6].mxu1 }
 0x280   : > { %v1295_v41 = vsub.f32 %v1876_v32, %v1283_v36  ;;  %v1287_v42 = vadd.f32 %v1286_v3, %v1216_v38  ;;  %v1288_v13 = vpop.f32.mrb[7].mxu1 }
 0x281   : > { %v1344_v43 = vadd.f32 %v1343_v12, %v1302_v39  ;;  %v1296_v45 = vsub.f32 %v1668_v44, %v1285_v40  ;;  %v1289_v46 = vadd.f32 %v1288_v13, %v1216_v38 }
 0x282   : > { %v1303_v47 = vand.u32 2147483647, %v1295_v41  ;;  %v1297_v48 = vsub.f32 %v1879_v33, %v1287_v42 }
 0x283   : > { %v1304_v49 = vand.u32 2147483647, %v1296_v45  ;;  %v1298_v52 = vsub.f32 %v1669_v51, %v1289_v46 }
 0x284   : > { %v1345_v50 = vadd.f32 %v1344_v43, %v1303_v47  ;;  %v1305_v54 = vand.u32 2147483647, %v1297_v48 }
 0x285   : > { %v1306_v55 = vand.u32 2147483647, %v1298_v52 }
 0x286   : > { %v1346_v53 = vadd.f32 %v1345_v50, %v1304_v49 }
 0x288   : > { %v1347_v56 = vadd.f32 %v1346_v53, %v1305_v54 }
 0x28a   : > { %v1348_v57 = vadd.f32 %v1347_v56, %v1306_v55 }
 0x28c   : > { %1349 = vadd.xlane.f32.xlu0 %v1348_v57 }
 0x319   : > { %v1350_v32 = vpop.xlane.xlu0 %1349 }
 0x31a   : > { %v1351_v58 = vrot.slane %v1350_v32, 4 }
 0x31c   : > { %v1352_v59 = vadd.f32 %v1351_v58, %v1350_v32 }
 0x31e   : > { %v1353_v0 = vrot.slane %v1352_v59, 2 }
 0x320   : > { %v1354_v60 = vadd.f32 %v1353_v0, %v1352_v59 }
 0x322   : > { %v1355_v61 = vrot.slane %v1354_v60, 1 }
 0x324   : > { %v1356_v62 = vadd.f32 %v1355_v61, %v1354_v60 }
 0x326   : > { %1595 = vpush %v1356_v62 }
 0x357   : > { %s1596_s19 = spop %1595 }
 0x358   : > { %v1358_v33 = vstv %s1596_s19 }
 0x359   : > { %1360 = vst.msk [vmem:[%s412_s13] sm:$0x1] %vm1359_vm1, %v1358_v33 }
 0x35a PF: > { %s20_s29 = sadd.s32 1, %s1730_s29   ;;  %s2069_s27 = smov %s1726_s28 }
 0x35b   : > { %p17_p4 = scmp.ge.s32.totalorder %s20_s29, 4   ;;  %s2070_s28 = smov %s2072_s9 }
 0x35d   :  { %19 = sbr.rel (!%p17_p4) target bundleno = 3 (0x3), region = 105 }
 0x364   :  { %1378 = vsyncpa [#allocation4], 1 }
 0x365   :  { %1380 = vsyncpa [#allocation4 + $0x1], 1 }
 0x366   :  { %1381 = vsyncpa [#allocation6], 1 }

</bundles_post_ra>
